<compile_context>
chip_gen: v5e
topology: v5e:2x2
jax: 0.10.0
libtpu: 0.0.40
codegen_flags: <defaults>
</compile_context>

<pallas_src>
import jax
import jax.numpy as jnp
from jax.experimental import pallas as pl
from jax.experimental.pallas import tpu as pltpu


def _soft_ce_kernel(x_ref, t_ref, o_ref):
    """One batch tile: write the tile's partial loss sum into o_ref (1, 8, 128)."""
    x = x_ref[...].astype(jnp.float32)              # (tile_n, C)
    t = t_ref[...].astype(jnp.float32)              # (tile_n, C)

    # Numerically-stable logsumexp along the class (lane) axis.
    m = jnp.max(x, axis=-1, keepdims=True)          # (tile_n, 1)
    z = x - m                                       # (tile_n, C)
    lse = jnp.log(jnp.sum(jnp.exp(z), axis=-1, keepdims=True))  # (tile_n, 1)

    # -sum(t * (z - lse)) == lse * sum(t) - sum(t * z)  (no sum(t)==1 assumption)
    t_sum = jnp.sum(t, axis=-1, keepdims=True)            # (tile_n, 1)
    t_dot_z = jnp.sum(t * z, axis=-1, keepdims=True)      # (tile_n, 1)
    row_loss = lse * t_sum - t_dot_z                       # (tile_n, 1)

    # Per-tile partial sum, broadcast into a lane-dense full-vreg block
    # (avoids masked partial stores; wrapper reads [:, 0, 0]).
    partial = jnp.sum(row_loss)
    o_ref[...] = jnp.broadcast_to(partial, o_ref.shape)


def _round_up(v, m):
    return -(-v // m) * m


def _pick_tile_n(n, c, in_itemsize, vmem_budget_bytes, min_grid_steps=8):
    """Largest multiple-of-16 batch tile whose true working set fits the budget.

    Working set per row = double-buffered input DMAs (2 inputs x 2 buffers)
    plus ~5 f32 in-kernel temporaries (x_f32, t_f32, z, exp(z), t*z).
    """
    dma_bytes = 2 * 2 * c * in_itemsize   # 2 inputs x 2 pipeline buffers
    temp_bytes = 5 * c * 4                # f32 intermediates materialized in-kernel
    per_row = max(dma_bytes + temp_bytes, 1)

    tile = vmem_budget_bytes // per_row
    tile = min(tile, 1024)                # past ~1K rows the step overhead is amortized

    # Keep >= ~min_grid_steps grid steps for large batches so both TensorCores
    # on v7x get work (>= 4 steps each); neutral on single-TC v5e/v6e.
    n_r16 = _round_up(max(n, 1), 16)
    step_cap = max(256, ((n_r16 // min_grid_steps) // 16) * 16)
    tile = min(tile, step_cap)

    tile = min(tile, n_r16)               # don't exceed the (rounded-up) batch
    tile = max(16, (tile // 16) * 16)     # multiple of 16: bf16 tiles are (16, 128)
    return int(tile), per_row


def soft_target_cross_entropy(x, target, *, vmem_budget_bytes=6 * 1024 * 1024):
    """x: (N, C) logits; target: (N, C) soft labels. Returns scalar f32 loss.

    Accepts f32/bf16/fp16 inputs; compute is f32 inside the kernel.
    """
    assert x.shape == target.shape and x.ndim == 2
    n, c = x.shape
    itemsize = max(jnp.dtype(x.dtype).itemsize, jnp.dtype(target.dtype).itemsize)
    tile_n, per_row_bytes = _pick_tile_n(n, c, itemsize, vmem_budget_bytes)

    # Pad the batch to a multiple of tile_n. Padded rows get target == 0, so
    # they contribute exactly 0 to the loss sum (padded logits are irrelevant).
    n_pad = pl.cdiv(n, tile_n) * tile_n
    if n_pad != n:
        pad = n_pad - n
        x = jnp.pad(x, ((0, pad), (0, 0)))
        target = jnp.pad(target, ((0, pad), (0, 0)))
    num_tiles = n_pad // tile_n

    # Explicit scoped-VMEM limit sized to the real working set (inputs + f32
    # temporaries + output blocks), with 2x headroom, capped at 32 MiB so it
    # stays comfortable on v7x (64 MiB physical) and well under v5e/v6e's
    # 128 MiB physical.
    working_set = tile_n * per_row_bytes + 2 * (8 * 128 * 4)
    vmem_limit = int(min(32 * 1024 * 1024, max(8 * 1024 * 1024, 2 * working_set)))

    partials = pl.pallas_call(
        _soft_ce_kernel,
        out_shape=jax.ShapeDtypeStruct((num_tiles, 8, 128), jnp.float32),
        grid_spec=pltpu.PrefetchScalarGridSpec(
            num_scalar_prefetch=0,
            grid=(num_tiles,),
            in_specs=[
                pl.BlockSpec((tile_n, c), lambda i: (i, 0)),
                pl.BlockSpec((tile_n, c), lambda i: (i, 0)),
            ],
            out_specs=pl.BlockSpec((1, 8, 128), lambda i: (i, 0, 0)),
        ),
        compiler_params=pltpu.CompilerParams(
            # Per-tile partial sums are independent -> safe to shard the grid
            # across both TensorCores on v7x; neutral on single-TC v5e/v6e.
            dimension_semantics=("parallel",),
            vmem_limit_bytes=vmem_limit,
        ),
    )(x, target)

    # Padded rows contribute 0; divide by the ORIGINAL batch size.
    return jnp.sum(partials[:, 0, 0]) / jnp.float32(n)


if __name__ == "__main__":
    key = jax.random.PRNGKey(0)
    k1, k2, k3, k4 = jax.random.split(key, 4)

    # Small demo: batch=16, classes=32, f32 inputs — tight comparison vs JAX ref.
    N, C = 16, 32
    x = jax.random.normal(k1, (N, C), dtype=jnp.float32)
    target = jax.nn.softmax(jax.random.normal(k2, (N, C), dtype=jnp.float32), axis=-1)

    loss = jax.block_until_ready(soft_target_cross_entropy(x, target))
    ref = jnp.mean(jnp.sum(-target * jax.nn.log_softmax(x, axis=-1), axis=-1))
    assert jnp.allclose(loss, ref, rtol=1e-5, atol=1e-5), (loss, ref)

    # Ragged batch (exercises zero-target padding) with bf16 inputs
    # (producer-supplied bf16 halves HBM bytes; compute still f32 in-kernel).
    N2, C2 = 10, 32
    x2 = jax.random.normal(k3, (N2, C2), dtype=jnp.float32).astype(jnp.bfloat16)
    t2 = jax.nn.softmax(
        jax.random.normal(k4, (N2, C2), dtype=jnp.float32), axis=-1
    ).astype(jnp.bfloat16)

    loss2 = jax.block_until_ready(soft_target_cross_entropy(x2, t2))
    ref2 = jnp.mean(
        jnp.sum(
            -t2.astype(jnp.float32) * jax.nn.log_softmax(x2.astype(jnp.float32), axis=-1),
            axis=-1,
        )
    )
    assert jnp.allclose(loss2, ref2, rtol=2e-2, atol=2e-2), (loss2, ref2)

    print("KERNEL_OK")
</pallas_src>

<mosaic_0001>
module attributes {stable_mosaic.version = 11 : i64} {
  func.func @_soft_ce_kernel(%arg0: i32, %arg1: memref<16x32xf32, #tpu.memory_space<vmem>>, %arg2: memref<16x32xf32, #tpu.memory_space<vmem>>, %arg3: memref<1x8x128xf32, #tpu.memory_space<vmem>>) attributes {dimension_semantics = [#tpu.dimension_semantics<parallel>], iteration_bounds = array<i64: 1>, scalar_prefetch = 0 : i64, scratch_operands = 0 : i64, tpu.core_type = #tpu.core_type<tc>, window_params = [{transform_indices = @transform_0, window_bounds = array<i64: 16, 32>}, {transform_indices = @transform_1, window_bounds = array<i64: 16, 32>}, {transform_indices = @transform_2, window_bounds = array<i64: 1, 8, 128>}]} {
    %c0 = arith.constant 0 : index
    %c0_0 = arith.constant 0 : index
    %0 = vector.load %arg1[%c0, %c0_0] : memref<16x32xf32, #tpu.memory_space<vmem>>, vector<16x32xf32>
    %c0_1 = arith.constant 0 : index
    %c0_2 = arith.constant 0 : index
    %1 = vector.load %arg2[%c0_1, %c0_2] : memref<16x32xf32, #tpu.memory_space<vmem>>, vector<16x32xf32>
    %cst = arith.constant dense<0xFF800000> : vector<16xf32>
    %2 = vector.multi_reduction <maximumf>, %0, %cst [1] : vector<16x32xf32> to vector<16xf32>
    %3 = vector.shape_cast %2 : vector<16xf32> to vector<16x1xf32>
    %4 = vector.broadcast %3 : vector<16x1xf32> to vector<16x32xf32>
    %5 = arith.subf %0, %4 : vector<16x32xf32>
    %6 = math.exp %5 : vector<16x32xf32>
    %cst_3 = arith.constant dense<0.000000e+00> : vector<16xf32>
    %7 = vector.multi_reduction <add>, %6, %cst_3 [1] : vector<16x32xf32> to vector<16xf32>
    %8 = vector.shape_cast %7 : vector<16xf32> to vector<16x1xf32>
    %9 = math.log %8 : vector<16x1xf32>
    %cst_4 = arith.constant dense<0.000000e+00> : vector<16xf32>
    %10 = vector.multi_reduction <add>, %1, %cst_4 [1] : vector<16x32xf32> to vector<16xf32>
    %11 = vector.shape_cast %10 : vector<16xf32> to vector<16x1xf32>
    %12 = arith.mulf %1, %5 : vector<16x32xf32>
    %cst_5 = arith.constant dense<0.000000e+00> : vector<16xf32>
    %13 = vector.multi_reduction <add>, %12, %cst_5 [1] : vector<16x32xf32> to vector<16xf32>
    %14 = vector.shape_cast %13 : vector<16xf32> to vector<16x1xf32>
    %15 = arith.mulf %9, %11 : vector<16x1xf32>
    %16 = arith.subf %15, %14 : vector<16x1xf32>
    %17 = vector.shape_cast %16 : vector<16x1xf32> to vector<1x16x1xf32>
    %cst_6 = arith.constant dense<0.000000e+00> : vector<1xf32>
    %18 = vector.multi_reduction <add>, %17, %cst_6 [1, 2] : vector<1x16x1xf32> to vector<1xf32>
    %19 = vector.shape_cast %18 : vector<1xf32> to vector<1x1x1xf32>
    %20 = vector.extract %19[0, 0, 0] : f32 from vector<1x1x1xf32>
    %21 = vector.broadcast %20 : f32 to vector<1x8x128xf32>
    %c0_7 = arith.constant 0 : index
    %c0_8 = arith.constant 0 : index
    %c0_9 = arith.constant 0 : index
    %22 = vector.load %arg3[%c0_7, %c0_8, %c0_9] : memref<1x8x128xf32, #tpu.memory_space<vmem>>, vector<1x8x128xf32>
    tpu.vector_store %arg3[%c0_7, %c0_8, %c0_9], %21 {strides = array<i32>} : memref<1x8x128xf32, #tpu.memory_space<vmem>>, vector<1x8x128xf32>,
    return
  }
  func.func @transform_0(%arg0: i32) -> (i32, i32) {
    %c0_i32 = arith.constant 0 : i32
    %c0_i32_0 = arith.constant 0 : i32
    return %arg0, %c0_i32 : i32, i32
  }
  func.func @transform_1(%arg0: i32) -> (i32, i32) {
    %c0_i32 = arith.constant 0 : i32
    %c0_i32_0 = arith.constant 0 : i32
    return %arg0, %c0_i32 : i32, i32
  }
  func.func @transform_2(%arg0: i32) -> (i32, i32, i32) {
    %c0_i32 = arith.constant 0 : i32
    %c0_i32_0 = arith.constant 0 : i32
    %c0_i32_1 = arith.constant 0 : i32
    return %arg0, %c0_i32, %c0_i32_0 : i32, i32, i32
  }
}

</mosaic_0001>

<bundles_post_ra>
// kernel: tpu_custom_call.1
= control target key start
LH: loop header
LB: loop body
LE: loop exit
PB: predicated region body
PF: predicated region fallthrough
CT: control target
= control target key end

     0   :  { %7 = vsyncpa [#allocation3], 0  ;;  %s252_s0 = inlined_call_operand.hbm [shape: f32[16,32], index: 0, kind: input, shape index: {}]   ;;  %s253_s1 = inlined_call_operand.hbm [shape: f32[16,32], index: 1, kind: input, shape index: {}]   ;;  %s254_s2 = inlined_call_operand.hbm [shape: f32[1,8,128], index: 2, kind: output, shape index: {}]  }
   0x1   :  { %8 = vsyncpa [#allocation6], 0 }
   0x2   :  { %9 = vsyncpa [#allocation4], 0  ;;  %s14_s11 = sshll.u32 %s252_s0, 4  ;;  %s215_s12 = smov [#allocation2]   ;;  %s15_s11 = int_to_ptr.hbm [resolvable:$true] %s14_s11 }
   0x3   :  { %s16_s13 = sshll.u32 %s215_s12, 4  ;;  %s27_s16 = sshll.u32 %s253_s1, 4  ;;  %s17_s13 = int_to_ptr.vmem [resolvable:$true] %s16_s13  ;;  %s28_s16 = int_to_ptr.hbm [resolvable:$true] %s27_s16 }
   0x4   :  { %s216_s17 = smov 128   ;;  %s217_s18 = smov 8  }
   0x5   :  { %22 = dma.hbm_to_vmem [thread:$0]  %s15_s11, 256, %s17_s13, [#allocation3], %s216_s17, %s216_s17, %s217_s18  }
   0x6   :  { %s218_s19 = smov [#allocation5]  }
   0x7   :  { %s29_s20 = sshll.u32 %s218_s19, 4  ;;  %s30_s20 = int_to_ptr.vmem [resolvable:$true] %s29_s20 }
   0x8   :  { %35 = dma.hbm_to_vmem [thread:$0]  %s28_s16, 256, %s30_s20, [#allocation6], %s216_s17, %s216_s17, %s217_s18  }
   0x9   :  { %209 = dma.done.wait [#allocation3], 256  }
   0xa   :  { %210 = vsyncadd [#allocation3], 4294967040 }
   0xb   :  { %211 = dma.done.wait [#allocation6], 256  }
   0xc   :  { %212 = vsyncadd [#allocation6], 4294967040  ;;  %vm48_vm0 = vcmask 261120   ;;  %v44_v0 = vld [vmem:[#allocation2] sm:$0xff]  ;;  %v45_v2 = vld [vmem:[#allocation2 + $0x8] sm:$0xff]  ;;  %vm89_vm1 = vcmask 7168  }
   0xd   :  { %v49_v1 = vsel %vm48_vm0, %v44_v0, -inf  ;;  %v52_v3 = vsel %vm48_vm0, %v45_v2, -inf  ;;  %v46_v4 = vld [vmem:[#allocation5] sm:$0xff]  ;;  %v47_v6 = vld [vmem:[#allocation5 + $0x8] sm:$0xff]  ;;  %s219_s0 = smov [#allocation7]   ;;  %s111_s23 = sshll.u32 %s254_s2, 4  ;;  %s112_s23 = int_to_ptr.hbm [resolvable:$true] %s111_s23 }
   0xe   :  { %50 = vmax.xlane.f32.xlu0 %v49_v1  ;;  %v71_v5 = vsel %vm48_vm0, %v46_v4, 0.0  ;;  %v74_v7 = vsel %vm48_vm0, %v47_v6, 0.0  ;;  %s109_s1 = sshll.u32 %s219_s0, 4  ;;  %s110_s1 = int_to_ptr.vmem [resolvable:$true] %s109_s1 }
   0xf   :  { %72 = vadd.xlane.f32.xlu2 %v71_v5 }
  0x16   :  { %53 = vmax.xlane.f32.xlu0 %v52_v3 }
  0x17   :  { %75 = vadd.xlane.f32.xlu2 %v74_v7 }
  0x81   :  { %v51_v8 = vpop.xlane.xlu0 %50 }
  0x82   :  { %v55_v9 = vsub.f32 %v44_v0, %v51_v8  ;;  %v73_v23 = vpop.xlane.xlu2 %72 }
  0x84   :  { %v57_v10 = vmul.f32 1.442695, %v55_v9  ;;  %v77_v11 = vmul.f32 %v55_v9, %v46_v4 }
  0x86   :  { %129 = vpow2.f32 %v57_v10  ;;  %v79_v12 = vsel %vm48_vm0, %v77_v11, 0.0 }
  0x87   :  { %80 = vadd.xlane.f32.xlu0 %v79_v12 }
  0x89   :  { %v54_v13 = vpop.xlane.xlu0 %53 }
  0x8a   :  { %v56_v14 = vsub.f32 %v45_v2, %v54_v13  ;;  %v76_v29 = vpop.xlane.xlu2 %75 }
  0x8c   :  { %v130_v15 = vpop.eup %129  ;;  %v59_v16 = vmul.f32 1.442695, %v56_v14  ;;  %v78_v20 = vmul.f32 %v56_v14, %v47_v6 }
  0x8d   :  { %v61_v17 = vsel %vm48_vm0, %v130_v15, 0.0 }
  0x8e   :  { %131 = vpow2.f32 %v59_v16  ;;  %62 = vadd.xlane.f32.xlu1 %v61_v17  ;;  %v82_v21 = vsel %vm48_vm0, %v78_v20, 0.0 }
  0x94   :  { %v132_v18 = vpop.eup %131 }
  0x95   :  { %v64_v19 = vsel %vm48_vm0, %v132_v18, 0.0 }
  0x96   :  { %65 = vadd.xlane.f32.xlu1 %v64_v19 }
  0x9e   :  { %83 = vadd.xlane.f32.xlu1 %v82_v21 }
  0xfa   :  { %v81_v31 = vpop.xlane.xlu0 %80 }
 0x101   :  { %v63_v22 = vpop.xlane.xlu1 %62 }
 0x102   :  { %133 = vlog2.f32 %v63_v22 }
 0x108   :  { %v134_v24 = vpop.eup %133 }
 0x109   :  { %v66_v25 = vpop.xlane.xlu1 %65  ;;  %v68_v26 = vmul.f32 0.6931472, %v134_v24 }
 0x10a   :  { %135 = vlog2.f32 %v66_v25 }
 0x10b   :  { %v85_v27 = vmul.f32 %v73_v23, %v68_v26 }
 0x10d   :  { %v87_v32 = vsub.f32 %v85_v27, %v81_v31 }
 0x10f   :  { %v90_v36 = vsel %vm89_vm1, %v87_v32, 0.0 }
 0x110   :  { %v136_v28 = vpop.eup %135 }
 0x111   :  { %v70_v30 = vmul.f32 0.6931472, %v136_v28  ;;  %v84_v34 = vpop.xlane.xlu1 %83 }
 0x113   :  { %v86_v33 = vmul.f32 %v76_v29, %v70_v30 }
 0x115   :  { %v88_v35 = vsub.f32 %v86_v33, %v84_v34 }
 0x117   :  { %v91_v37 = vsel %vm89_vm1, %v88_v35, 0.0 }
 0x118   :  { %v92_v38 = vadd.f32 %v91_v37, %v90_v36 }
 0x11a   :  { %93 = vadd.xlane.f32.xlu2 %v92_v38 }
 0x18d   :  { %v94_v39 = vpop.xlane.xlu2 %93 }
 0x18e   :  { %v95_v40 = vrot.slane %v94_v39, 4 }
 0x190   :  { %v96_v41 = vadd.f32 %v95_v40, %v94_v39 }
 0x192   :  { %v97_v42 = vrot.slane %v96_v41, 2 }
 0x194   :  { %v98_v43 = vadd.f32 %v97_v42, %v96_v41 }
 0x196   :  { %v99_v44 = vrot.slane %v98_v43, 1 }
 0x198   :  { %v100_v45 = vadd.f32 %v99_v44, %v98_v43 }
 0x19a   :  { %122 = vpush %v100_v45 }
 0x1cb   :  { %s123_s24 = spop %122 }
 0x1cc   :  { %v102_v46 = vstv %s123_s24 }
 0x1cd   :  { %103 = vst [vmem:[#allocation7] sm:$0xff] %v102_v46 }
 0x1ce   :  { %114 = dma.vmem_to_hbm [thread:$0]  %s110_s1, 128, %s112_s23, [#allocation4]  }
 0x1cf   :  { %213 = dma.done.wait [#allocation4], 128  }
 0x1d0   :  { %214 = vsyncadd [#allocation4], 4294967168 }
 0x1d1   :  { %119 = vsyncpa [#allocation3], 1 }
 0x1d2   :  { %120 = vsyncpa [#allocation6], 1 }
 0x1d3   :  { %121 = vsyncpa [#allocation4], 1 }

</bundles_post_ra>
